<compile_context>
chip_gen: v5e
topology: v5e:2x2
jax: 0.10.0
libtpu: 0.0.40
codegen_flags: <defaults>
</compile_context>

<pallas_src>
import jax
import jax.numpy as jnp
from jax.experimental import pallas as pl
from jax.experimental.pallas import tpu as pltpu

LANES = 128
ROW_ALIGN = 32  # multiple of 32 keeps sub-32-bit (bf16/int8/fp8) output stores unmasked


def _cast_kernel(x_ref, o_ref):
    # Elementwise dtype conversion on the current VMEM tile (VPU only).
    o_ref[...] = x_ref[...].astype(o_ref.dtype)


def _round_up(v, m):
    return ((v + m - 1) // m) * m


def to_dtype(x, dtype, *, max_tile_rows=8192, small_bypass_bytes=512 * 1024):
    """Pallas-backed equivalent of torch.Tensor.to(dtype) (pure dtype cast)."""
    dtype = jnp.dtype(dtype)
    if x.dtype == dtype:
        # PyTorch .to() is a no-op (returns self) when dtype already matches.
        return x

    n = x.size
    # Small-tensor bypass: launch / pad overhead dwarfs the cast itself.
    if n == 0 or n * x.dtype.itemsize <= small_bypass_bytes:
        return x.astype(dtype)

    orig_shape = x.shape
    flat = x.reshape(-1)

    # Pad only if needed, and only up to one lane row (128 elements).
    pad = (-n) % LANES
    if pad:
        flat = jnp.pad(flat, (0, pad))
    rows = (n + pad) // LANES
    x2d = flat.reshape(rows, LANES)

    # Tile selection: largest tile <= max_tile_rows, 32-row aligned, aiming for
    # >= 4 grid steps (megacore / dual-TC sharding). Partial edge block is fine.
    if rows <= ROW_ALIGN:
        tr = rows  # single full block; block dim == array dim is always legal
    else:
        tr = min(max_tile_rows, _round_up(pl.cdiv(rows, 4), ROW_ALIGN))
    grid = (pl.cdiv(rows, tr),)

    in_block_bytes = tr * LANES * x.dtype.itemsize
    out_block_bytes = tr * LANES * dtype.itemsize
    # Double-buffered input + output blocks, plus headroom; 32 MiB floor is safe
    # on v5e/v6e (128 MiB physical VMEM) and v7x (64 MiB physical VMEM).
    vmem_limit = max(2 * (in_block_bytes + out_block_bytes) + (4 << 20), 32 << 20)

    out2d = pl.pallas_call(
        _cast_kernel,
        out_shape=jax.ShapeDtypeStruct((rows, LANES), dtype),
        grid_spec=pltpu.PrefetchScalarGridSpec(
            num_scalar_prefetch=0,
            grid=grid,
            in_specs=[pl.BlockSpec((tr, LANES), lambda i: (i, 0))],
            out_specs=pl.BlockSpec((tr, LANES), lambda i: (i, 0)),
        ),
        compiler_params=pltpu.CompilerParams(
            dimension_semantics=("parallel",),
            vmem_limit_bytes=int(vmem_limit),
        ),
        cost_estimate=pl.CostEstimate(
            flops=0,
            transcendentals=0,
            bytes_accessed=int(n * (x.dtype.itemsize + dtype.itemsize)),
        ),
    )(x2d)

    if pad:
        return out2d.reshape(-1)[:n].reshape(orig_shape)
    return out2d.reshape(orig_shape)


if __name__ == "__main__":
    root = jax.random.PRNGKey(0)
    k0, k1, k2 = jax.random.split(root, 3)
    target_dtype = jnp.bfloat16  # ToDtype(dtype=torch.bfloat16) equivalent

    # 1) Module-consistent small input (B=2, C=4, H=16, W=16).
    #    Force the Pallas path (the bypass would normally handle tensors this small).
    x = jax.random.normal(k0, (2, 4, 16, 16), dtype=jnp.float32)
    y = jax.block_until_ready(to_dtype(x, target_dtype, small_bypass_bytes=0))
    ref = x.astype(target_dtype)
    assert y.dtype == ref.dtype
    assert y.shape == x.shape
    assert bool(jnp.all(y == ref))

    # Default (bypass) path must agree too.
    y_bypass = jax.block_until_ready(to_dtype(x, target_dtype))
    assert bool(jnp.all(y_bypass == ref))

    # 2) Element count not a multiple of 128 -> exercises the pad + tail-slice path.
    x_odd = jax.random.normal(k1, (3, 5, 7), dtype=jnp.float32)
    y_odd = jax.block_until_ready(to_dtype(x_odd, target_dtype, small_bypass_bytes=0))
    assert y_odd.shape == x_odd.shape
    assert bool(jnp.all(y_odd == x_odd.astype(target_dtype)))

    # 3) Mid-sized tensor -> multi-step parallel grid with a masked partial edge block.
    x_big = jax.random.normal(k2, (8, 3, 112, 112), dtype=jnp.float32)
    y_big = jax.block_until_ready(to_dtype(x_big, target_dtype))
    assert y_big.shape == x_big.shape
    assert bool(jnp.all(y_big == x_big.astype(target_dtype)))

    print("KERNEL_OK")
</pallas_src>

<mosaic_0001>
module attributes {stable_mosaic.version = 11 : i64} {
  func.func @_cast_kernel(%arg0: i32, %arg1: memref<16x128xf32, #tpu.memory_space<vmem>>, %arg2: memref<16x128xbf16, #tpu.memory_space<vmem>>) attributes {dimension_semantics = [#tpu.dimension_semantics<parallel>], iteration_bounds = array<i64: 1>, scalar_prefetch = 0 : i64, scratch_operands = 0 : i64, tpu.core_type = #tpu.core_type<tc>, window_params = [{transform_indices = @transform_0, window_bounds = array<i64: 16, 128>}, {transform_indices = @transform_1, window_bounds = array<i64: 16, 128>}]} {
    %c0 = arith.constant 0 : index
    %c0_0 = arith.constant 0 : index
    %0 = vector.load %arg1[%c0, %c0_0] : memref<16x128xf32, #tpu.memory_space<vmem>>, vector<16x128xf32>
    %1 = arith.truncf %0 : vector<16x128xf32> to vector<16x128xbf16>
    %c0_1 = arith.constant 0 : index
    %c0_2 = arith.constant 0 : index
    %2 = vector.load %arg2[%c0_1, %c0_2] : memref<16x128xbf16, #tpu.memory_space<vmem>>, vector<16x128xbf16>
    tpu.vector_store %arg2[%c0_1, %c0_2], %1 {strides = array<i32>} : memref<16x128xbf16, #tpu.memory_space<vmem>>, vector<16x128xbf16>,
    return
  }
  func.func @transform_0(%arg0: i32) -> (i32, i32) {
    %c0_i32 = arith.constant 0 : i32
    %c0_i32_0 = arith.constant 0 : i32
    return %arg0, %c0_i32 : i32, i32
  }
  func.func @transform_1(%arg0: i32) -> (i32, i32) {
    %c0_i32 = arith.constant 0 : i32
    %c0_i32_0 = arith.constant 0 : i32
    return %arg0, %c0_i32 : i32, i32
  }
}

</mosaic_0001>

<bundles_post_ra>
// kernel: tpu_custom_call.1
= control target key start
LH: loop header
LB: loop body
LE: loop exit
PB: predicated region body
PF: predicated region fallthrough
CT: control target
= control target key end

     0   :  { %6 = vsyncpa [#allocation3], 0  ;;  %s135_s0 = inlined_call_operand.hbm [shape: f32[16,128], index: 0, kind: input, shape index: {}]   ;;  %s136_s1 = inlined_call_operand.hbm [shape: bf16[16,128], index: 1, kind: output, shape index: {}]  }
   0x1   :  { %7 = vsyncpa [#allocation4], 0  ;;  %s12_s8 = sshll.u32 %s135_s0, 4  ;;  %s113_s9 = smov [#allocation2]   ;;  %s13_s8 = int_to_ptr.hbm [resolvable:$true] %s12_s8 }
   0x2   :  { %s14_s10 = sshll.u32 %s113_s9, 4  ;;  %s114_s11 = smov 128   ;;  %s15_s10 = int_to_ptr.vmem [resolvable:$true] %s14_s10 }
   0x3   :  { %s115_s12 = smov 8  }
   0x4   :  { %20 = dma.hbm_to_vmem [thread:$0]  %s13_s8, 256, %s15_s10, [#allocation3], %s114_s11, %s114_s11, %s115_s12  }
   0x5   :  { %109 = dma.done.wait [#allocation3], 256  }
   0x6   :  { %110 = vsyncadd [#allocation3], 4294967040  ;;  %s116_s13 = smov [#allocation5]   ;;  %s37_s17 = sshll.u32 %s136_s1, 4  ;;  %v25_v0 = vld [vmem:[#allocation2] sm:$0xff]  ;;  %v26_v1 = vld [vmem:[#allocation2 + $0x8] sm:$0xff]  ;;  %s38_s17 = int_to_ptr.hbm [resolvable:$true] %s37_s17 }
   0x7   :  { %s35_s14 = sshll.u32 %s116_s13, 4  ;;  %v53_v2 = vpack.c.bf16 %v26_v1, %v25_v0  ;;  %s117_s0 = smov 64   ;;  %s36_s14 = int_to_ptr.vmem [resolvable:$true] %s35_s14 }
   0x8   :  { %s118_s18 = smov 4  }
   0x9   :  { %54 = vst [vmem:[#allocation5] sm:$0xff] %v53_v2  }
   0xa   :  { %43 = dma.vmem_to_hbm [thread:$0]  %s36_s14, 128, %s38_s17, [#allocation4], %s117_s0, %s117_s0, %s118_s18  }
   0xb   :  { %111 = dma.done.wait [#allocation4], 128  }
   0xc   :  { %112 = vsyncadd [#allocation4], 4294967168 }
   0xd   :  { %48 = vsyncpa [#allocation3], 1 }
   0xe   :  { %49 = vsyncpa [#allocation4], 1 }

</bundles_post_ra>
